<compile_context>
chip_gen: v6e
topology: v6e:2x2x1
jax: 0.10.0
libtpu: 0.0.40
codegen_flags: <defaults>
</compile_context>

<pallas_src>
import numpy as np
import jax
import jax.numpy as jnp
from jax.experimental import pallas as pl
from jax.experimental.pallas import tpu as pltpu


K = 5          # conv kernel size (padding=2 -> 'same'; requires odd K)
C1 = 16        # conv1 out channels
C2 = 32        # conv2 out channels
F = 128        # fc1 out features


def _round_up(n, m):
    return (n + m - 1) // m * m


# ----------------------------------------------------------------------------
# Fused kernel: three dense matmuls + bias + ReLU, no in-kernel relayout.
# ----------------------------------------------------------------------------
def _fused_kernel(x_ref, w1_ref, w2_ref, fc_ref, o_ref):
    """x_ref : (Bt, L*Cin)     position-major input activations
       w*_ref: (rows+1, cols)  weight matrix with its bias packed as last row
                               (rows is a multiple of 8 -> aligned slices)
       o_ref : (Bt, F)
    """
    def dense_relu(h, w_ref):
        n = w_ref.shape[0] - 1                       # weight rows; bias = row n
        y = jnp.dot(h, w_ref[0:n, :], preferred_element_type=jnp.float32)
        return jnp.maximum(y + w_ref[n:n + 1, :], 0.0)

    h = dense_relu(x_ref[...], w1_ref)               # conv1 + ReLU   (Bt, L*C1)
    h = dense_relu(h, w2_ref)                        # conv2 + ReLU   (Bt, L*C2)
    o_ref[...] = dense_relu(h, fc_ref)               # fc1   + ReLU   (Bt, F)


# ----------------------------------------------------------------------------
# One-time parameter conversion (hoisted out of the forward path)
# ----------------------------------------------------------------------------
def _conv1d_to_banded(w, L):
    """PyTorch Conv1d weight (Cout, Cin, K) with 'same' zero padding ->
    dense banded matrix Wb of shape (L*Cin, L*Cout) so that for a
    position-major activation row a[l*Cin + ci] = x[ci, l]:
        (a @ Wb)[lo*Cout + co] == conv1d(x, w)[co, lo]
    """
    Cout, Cin, Kk = w.shape
    pad = (Kk - 1) // 2
    Wb = np.zeros((L, Cin, L, Cout), dtype=np.float32)
    for lo in range(L):                  # output position
        for k in range(Kk):              # tap
            li = lo + k - pad            # input position
            if 0 <= li < L:
                Wb[li, :, lo, :] = w[:, :, k].T
    return Wb.reshape(L * Cin, L * Cout)


def prepare_params(params, L):
    """PyTorch-layout params -> three packed, lane-dense f32 kernel buffers."""
    assert K % 2 == 1, "same-padding logic assumes odd kernel size"
    w1 = np.asarray(params["conv1_w"], np.float32)    # (C1, Cin, K)
    b1 = np.asarray(params["conv1_b"], np.float32)    # (C1,)
    w2 = np.asarray(params["conv2_w"], np.float32)    # (C2, C1, K)
    b2 = np.asarray(params["conv2_b"], np.float32)    # (C2,)
    fcw = np.asarray(params["fc1_w"], np.float32)     # (F, C2*L)
    fcb = np.asarray(params["fc1_b"], np.float32)     # (F,)
    Cin = w1.shape[1]

    w1b = _conv1d_to_banded(w1, L)                    # (L*Cin, L*C1)
    w2b = _conv1d_to_banded(w2, L)                    # (L*C1,  L*C2)
    b1t = np.tile(b1, L)[None, :]                     # (1, L*C1)
    b2t = np.tile(b2, L)[None, :]                     # (1, L*C2)
    # fc columns: torch flattens (B, C2, L) channel-major (col = c2*L + l);
    # our activations are position-major (col = l*C2 + c2) -> permute once.
    fcw_m = np.transpose(fcw.reshape(F, C2, L), (2, 1, 0)).reshape(L * C2, F)
    fcb_m = fcb[None, :]

    pack1 = jnp.asarray(np.concatenate([w1b, b1t], axis=0))      # (L*Cin+1, L*C1)
    pack2 = jnp.asarray(np.concatenate([w2b, b2t], axis=0))      # (L*C1+1,  L*C2)
    pack3 = jnp.asarray(np.concatenate([fcw_m, fcb_m], axis=0))  # (L*C2+1,  F)
    return pack1, pack2, pack3


# ----------------------------------------------------------------------------
# Forward pass (matches OneDConvNet.forward)
# ----------------------------------------------------------------------------
def one_d_conv_net_forward(x_ncl, prepped, *, block_b=128):
    """x_ncl: (B, Cin, L) PyTorch NCL layout.  prepped: from prepare_params."""
    w1p, w2p, fcp = prepped
    B, Cin, L = x_ncl.shape

    # Layout glue (plain XLA, outside the custom call): NCL -> position-major.
    x_lane = jnp.transpose(x_ncl, (0, 2, 1)).reshape(B, L * Cin)

    # Batch tiling: >= 8 sublanes per step, parallel grid over batch tiles.
    bt = min(block_b, _round_up(B, 8))
    bp = _round_up(B, bt)
    if bp != B:
        x_lane = jnp.pad(x_lane, ((0, bp - B), (0, 0)))
    grid = (bp // bt,)

    flops = 2 * bp * (L * Cin * L * C1 + L * C1 * L * C2 + L * C2 * F)
    bytes_accessed = 4 * (bp * L * Cin
                          + int(w1p.size) + int(w2p.size) + int(fcp.size)
                          + bp * F)

    out = pl.pallas_call(
        _fused_kernel,
        out_shape=jax.ShapeDtypeStruct((bp, F), jnp.float32),
        grid_spec=pltpu.PrefetchScalarGridSpec(
            num_scalar_prefetch=0,
            grid=grid,
            in_specs=[
                pl.BlockSpec((bt, L * Cin), lambda i: (i, 0)),
                # Weights: constant block index -> DMA'd once, stay resident.
                pl.BlockSpec(w1p.shape, lambda i: (0, 0)),
                pl.BlockSpec(w2p.shape, lambda i: (0, 0)),
                pl.BlockSpec(fcp.shape, lambda i: (0, 0)),
            ],
            out_specs=pl.BlockSpec((bt, F), lambda i: (i, 0)),
        ),
        compiler_params=pltpu.CompilerParams(
            dimension_semantics=("parallel",)),
        cost_estimate=pl.CostEstimate(flops=flops, transcendentals=0,
                                      bytes_accessed=bytes_accessed),
    )(x_lane, w1p, w2p, fcp)
    return out[:B]


# ----------------------------------------------------------------------------
# Pure-JAX reference (PyTorch semantics, NCL layout) for verification
# ----------------------------------------------------------------------------
def reference_forward(x_ncl, params):
    def conv1d(x, w, b):  # x: (B, Cin, L), w: (Cout, Cin, K)
        y = jax.lax.conv_general_dilated(
            x, w, window_strides=(1,), padding=[((K - 1) // 2,) * 2],
            dimension_numbers=("NCH", "OIH", "NCH"),
        )
        return jnp.maximum(y + b[None, :, None], 0.0)

    h = conv1d(x_ncl, params["conv1_w"], params["conv1_b"])
    h = conv1d(h, params["conv2_w"], params["conv2_b"])
    flat = h.reshape(h.shape[0], -1)
    return jnp.maximum(flat @ params["fc1_w"].T + params["fc1_b"], 0.0)


# ----------------------------------------------------------------------------
# Main
# ----------------------------------------------------------------------------
if __name__ == "__main__":
    B, Cin, L = 2, 4, 16      # batch, in_channels, sequence_length

    key = jax.random.PRNGKey(0)
    keys = jax.random.split(key, 7)

    # Deterministic synthetic parameters (shapes follow nn.Module __init__).
    params = {
        "conv1_w": 0.1 * jax.random.normal(keys[0], (C1, Cin, K), jnp.float32),
        "conv1_b": 0.1 * jax.random.normal(keys[1], (C1,), jnp.float32),
        "conv2_w": 0.1 * jax.random.normal(keys[2], (C2, C1, K), jnp.float32),
        "conv2_b": 0.1 * jax.random.normal(keys[3], (C2,), jnp.float32),
        "fc1_w": 0.05 * jax.random.normal(keys[4], (F, C2 * L), jnp.float32),
        "fc1_b": 0.05 * jax.random.normal(keys[5], (F,), jnp.float32),
    }
    x = jax.random.normal(keys[6], (B, Cin, L), jnp.float32)

    prepped = prepare_params(params, L)          # one-time weight conversion

    fwd = jax.jit(one_d_conv_net_forward)
    out = jax.block_until_ready(fwd(x, prepped))

    ref = jax.block_until_ready(reference_forward(x, params))
    assert out.shape == (B, F), out.shape
    max_err = float(jnp.max(jnp.abs(out - ref)))
    assert max_err < 1e-3, max_err

    print("KERNEL_OK")
</pallas_src>

<mosaic_0001>
module attributes {stable_mosaic.version = 11 : i64} {
  func.func @_fused_kernel(%arg0: i32, %arg1: memref<8x64xf32, #tpu.memory_space<vmem>>, %arg2: memref<65x256xf32, #tpu.memory_space<vmem>>, %arg3: memref<257x512xf32, #tpu.memory_space<vmem>>, %arg4: memref<513x128xf32, #tpu.memory_space<vmem>>, %arg5: memref<8x128xf32, #tpu.memory_space<vmem>>) attributes {dimension_semantics = [#tpu.dimension_semantics<parallel>], iteration_bounds = array<i64: 1>, scalar_prefetch = 0 : i64, scratch_operands = 0 : i64, tpu.core_type = #tpu.core_type<tc>, window_params = [{transform_indices = @transform_0, window_bounds = array<i64: 8, 64>}, {pipeline_mode = #tpu.pipeline_mode<synchronous>, transform_indices = @transform_1, window_bounds = array<i64: 65, 256>}, {pipeline_mode = #tpu.pipeline_mode<synchronous>, transform_indices = @transform_2, window_bounds = array<i64: 257, 512>}, {pipeline_mode = #tpu.pipeline_mode<synchronous>, transform_indices = @transform_3, window_bounds = array<i64: 513, 128>}, {transform_indices = @transform_4, window_bounds = array<i64: 8, 128>}]} {
    %c0 = arith.constant 0 : index
    %c0_0 = arith.constant 0 : index
    %0 = vector.load %arg1[%c0, %c0_0] : memref<8x64xf32, #tpu.memory_space<vmem>>, vector<8x64xf32>
    %c0_1 = arith.constant 0 : index
    %c0_2 = arith.constant 0 : index
    %1 = vector.load %arg2[%c0_1, %c0_2] : memref<65x256xf32, #tpu.memory_space<vmem>>, vector<64x256xf32>
    %cst = arith.constant dense<0.000000e+00> : vector<8x256xf32>
    %2 = tpu.matmul %0, %1, %cst {dimension_numbers = #tpu.dot_dimension_numbers<[1], [0], [0], [1], [0, 0, 1, 1], [], []>} : vector<8x64xf32>, vector<64x256xf32>, vector<8x256xf32> -> vector<8x256xf32>
    %c64 = arith.constant 64 : index
    %c0_3 = arith.constant 0 : index
    %3 = vector.load %arg2[%c64, %c0_3] : memref<65x256xf32, #tpu.memory_space<vmem>>, vector<1x256xf32>
    %4 = vector.broadcast %3 : vector<1x256xf32> to vector<8x256xf32>
    %5 = arith.addf %2, %4 : vector<8x256xf32>
    %cst_4 = arith.constant 0.000000e+00 : f32
    %6 = vector.broadcast %cst_4 : f32 to vector<8x256xf32>
    %7 = arith.maximumf %5, %6 : vector<8x256xf32>
    %c0_5 = arith.constant 0 : index
    %c0_6 = arith.constant 0 : index
    %8 = vector.load %arg3[%c0_5, %c0_6] : memref<257x512xf32, #tpu.memory_space<vmem>>, vector<256x512xf32>
    %cst_7 = arith.constant dense<0.000000e+00> : vector<8x512xf32>
    %9 = tpu.matmul %7, %8, %cst_7 {dimension_numbers = #tpu.dot_dimension_numbers<[1], [0], [0], [1], [0, 0, 1, 1], [], []>} : vector<8x256xf32>, vector<256x512xf32>, vector<8x512xf32> -> vector<8x512xf32>
    %c256 = arith.constant 256 : index
    %c0_8 = arith.constant 0 : index
    %10 = vector.load %arg3[%c256, %c0_8] : memref<257x512xf32, #tpu.memory_space<vmem>>, vector<1x512xf32>
    %11 = vector.broadcast %10 : vector<1x512xf32> to vector<8x512xf32>
    %12 = arith.addf %9, %11 : vector<8x512xf32>
    %cst_9 = arith.constant 0.000000e+00 : f32
    %13 = vector.broadcast %cst_9 : f32 to vector<8x512xf32>
    %14 = arith.maximumf %12, %13 : vector<8x512xf32>
    %c0_10 = arith.constant 0 : index
    %c0_11 = arith.constant 0 : index
    %15 = vector.load %arg4[%c0_10, %c0_11] : memref<513x128xf32, #tpu.memory_space<vmem>>, vector<512x128xf32>
    %cst_12 = arith.constant dense<0.000000e+00> : vector<8x128xf32>
    %16 = tpu.matmul %14, %15, %cst_12 {dimension_numbers = #tpu.dot_dimension_numbers<[1], [0], [0], [1], [0, 0, 1, 1], [], []>} : vector<8x512xf32>, vector<512x128xf32>, vector<8x128xf32> -> vector<8x128xf32>
    %c512 = arith.constant 512 : index
    %c0_13 = arith.constant 0 : index
    %17 = vector.load %arg4[%c512, %c0_13] : memref<513x128xf32, #tpu.memory_space<vmem>>, vector<1x128xf32>
    %18 = vector.broadcast %17 : vector<1x128xf32> to vector<8x128xf32>
    %19 = arith.addf %16, %18 : vector<8x128xf32>
    %cst_14 = arith.constant 0.000000e+00 : f32
    %20 = vector.broadcast %cst_14 : f32 to vector<8x128xf32>
    %21 = arith.maximumf %19, %20 : vector<8x128xf32>
    %c0_15 = arith.constant 0 : index
    %c0_16 = arith.constant 0 : index
    %22 = vector.load %arg5[%c0_15, %c0_16] : memref<8x128xf32, #tpu.memory_space<vmem>>, vector<8x128xf32>
    tpu.vector_store %arg5[%c0_15, %c0_16], %21 {strides = array<i32>} : memref<8x128xf32, #tpu.memory_space<vmem>>, vector<8x128xf32>,
    return
  }
  func.func @transform_0(%arg0: i32) -> (i32, i32) {
    %c0_i32 = arith.constant 0 : i32
    %c0_i32_0 = arith.constant 0 : i32
    return %arg0, %c0_i32 : i32, i32
  }
  func.func @transform_1(%arg0: i32) -> (i32, i32) {
    %c0_i32 = arith.constant 0 : i32
    %c0_i32_0 = arith.constant 0 : i32
    %c0_i32_1 = arith.constant 0 : i32
    return %c0_i32, %c0_i32_0 : i32, i32
  }
  func.func @transform_2(%arg0: i32) -> (i32, i32) {
    %c0_i32 = arith.constant 0 : i32
    %c0_i32_0 = arith.constant 0 : i32
    %c0_i32_1 = arith.constant 0 : i32
    return %c0_i32, %c0_i32_0 : i32, i32
  }
  func.func @transform_3(%arg0: i32) -> (i32, i32) {
    %c0_i32 = arith.constant 0 : i32
    %c0_i32_0 = arith.constant 0 : i32
    %c0_i32_1 = arith.constant 0 : i32
    return %c0_i32, %c0_i32_0 : i32, i32
  }
  func.func @transform_4(%arg0: i32) -> (i32, i32) {
    %c0_i32 = arith.constant 0 : i32
    %c0_i32_0 = arith.constant 0 : i32
    return %arg0, %c0_i32 : i32, i32
  }
}

</mosaic_0001>

<bundles_post_ra>
// kernel: one_d_conv_net_forward.1
= control target key start
LH: loop header
LB: loop body
LE: loop exit
PB: predicated region body
PF: predicated region fallthrough
CT: control target
= control target key end

     0   :  { %9 = vsyncpa [#allocation3], 0  ;;  %s889_s0 = inlined_call_operand.vmem [shape: f32[8,64], index: 0, kind: input, shape index: {}]   ;;  %s890_s1 = inlined_call_operand.hbm [shape: f32[65,256], index: 1, kind: input, shape index: {}]   ;;  %s891_s2 = inlined_call_operand.hbm [shape: f32[257,512], index: 2, kind: input, shape index: {}]   ;;  %s892_s3 = inlined_call_operand.hbm [shape: f32[513,128], index: 3, kind: input, shape index: {}]   ;;  %s893_s4 = inlined_call_operand.vmem [shape: f32[8,128], index: 4, kind: output, shape index: {}]  }
   0x1   :  { %10 = vsyncpa [#allocation5], 0  ;;  %s825_s15 = smov [#allocation4]  }
   0x2   :  { %s30_s16 = sshll.u32 %s825_s15, 4  ;;  %s31_s16 = int_to_ptr.vmem [resolvable:$true] %s30_s16 }
   0x3   :  { %s769_s17 = scalar_lea.vmem %s31_s16, 16896  ;;  %p774_p1 = scmp.lt.s32.totalorder %s31_s16, %s31_s16 }
   0x4   :  { %p770_p0 = scmp.ne.s32.totalorder %s31_s16, %s769_s17  ;;  %p775_p2 = scmp.lt.s32.totalorder %s769_s17, %s769_s17 }
   0x6   :  { %p776_p3 = por %p775_p2, %p774_p1 }
   0x8   :  { %p777_p4 = pnand %p776_p3, %p770_p0 }
   0xa   :  { %780 = shalt.err (!%p777_p4)
}
   0xb   :  { %s826_s18 = smov 512   ;;  %s827_s19 = smov 32  }
   0xc   :  { %36 = dma.hbm_to_vmem [thread:$0]  %s891_s2, 16896, %s31_s16, [#allocation5], %s826_s18, %s826_s18, %s827_s19  }
   0xd   :  { %s828_s22 = smov [#allocation2]  }
   0xe   :  { %s18_s23 = sshll.u32 %s828_s22, 4  ;;  %s19_s23 = int_to_ptr.vmem [resolvable:$true] %s18_s23 }
   0xf   :  { %s789_s24 = scalar_lea.vmem %s19_s23, 2304  ;;  %p794_p6 = scmp.lt.s32.totalorder %s19_s23, %s19_s23 }
  0x10   :  { %p790_p5 = scmp.ne.s32.totalorder %s19_s23, %s789_s24  ;;  %p795_p7 = scmp.lt.s32.totalorder %s789_s24, %s789_s24 }
  0x12   :  { %p796_p8 = por %p795_p7, %p794_p6 }
  0x14   :  { %p797_p9 = pnand %p796_p8, %p790_p5 }
  0x16   :  { %800 = shalt.err (!%p797_p9)
}
  0x17   :  { %s829_s25 = smov 256   ;;  %s830_s26 = smov 16  }
  0x18   :  { %24 = dma.hbm_to_vmem [thread:$0]  %s890_s1, 2304, %s19_s23, [#allocation3], %s829_s25, %s829_s25, %s830_s26  }
  0x19   :  { %s831_s29 = smov [#allocation6]  }
  0x1a   :  { %s42_s30 = sshll.u32 %s831_s29, 4  ;;  %s43_s30 = int_to_ptr.vmem [resolvable:$true] %s42_s30 }
  0x1b   :  { %s809_s2 = scalar_lea.vmem %s43_s30, 8320  ;;  %p814_p11 = scmp.lt.s32.totalorder %s43_s30, %s43_s30 }
  0x1c   :  { %p810_p10 = scmp.ne.s32.totalorder %s43_s30, %s809_s2  ;;  %p815_p12 = scmp.lt.s32.totalorder %s809_s2, %s809_s2 }
  0x1e   :  { %p816_p13 = por %p815_p12, %p814_p11 }
  0x20   :  { %p817_p0 = pnand %p816_p13, %p810_p10 }
  0x22   :  { %820 = shalt.err (!%p817_p0)
}
  0x23   :  { %s832_s5 = smov 128   ;;  %s833_s6 = smov 8  }
  0x24   :  { %48 = dma.hbm_to_vmem [thread:$0]  %s892_s3, 8320, %s43_s30, [#allocation5], %s832_s5, %s832_s5, %s833_s6  }
  0x25   :  { %821 = dma.done.wait [#allocation3], 2304  }
  0x26   :  { %822 = vsyncadd [#allocation3], 4294964992 }
  0x27   :  { %823 = dma.done.wait [#allocation5], 25216  }
  0x28   :  { %824 = vsyncadd [#allocation5], 4294942080  ;;  %v834_v0 = vmov 0.0   ;;  %v74_v1 = vld [vmem:[#allocation2 + $0x78] sm:$0xff]  ;;  %v73_v2 = vld [vmem:[#allocation2 + $0x70] sm:$0xff]  ;;  %vm88_vm0 = vcmask 523264  }
  0x29   :  { %156 = vmatprep.mubr.f32.mxu0 %v834_v0  ;;  %v72_v3 = vld [vmem:[#allocation2 + $0x68] sm:$0xff]  ;;  %108 = vmatprep.subr.mxu0 %v74_v1  ;;  %v71_v4 = vld [vmem:[#allocation2 + $0x60] sm:$0xff]  ;;  %v70_v5 = vld [vmem:[#allocation2 + $0x58] sm:$0xff] }
  0x2a   :  { %109 = vmatpush1.msra.mxu0 %v73_v2  ;;  %v69_v6 = vld [vmem:[#allocation2 + $0x50] sm:$0xff]  ;;  %v68_v7 = vld [vmem:[#allocation2 + $0x48] sm:$0xff]  ;;  %v67_v8 = vld [vmem:[#allocation2 + $0x40] sm:$0xff] }
  0x2b   :  { %110 = vmatprep.subr.mxu0 %v72_v3  ;;  %v226_v9 = vld [vmem:[#allocation4 + $0x1e8] sm:$0xff]  ;;  %v225_v11 = vld [vmem:[#allocation4 + $0x1e0] sm:$0xff]  ;;  %v64_v15 = vld [vmem:[#allocation2 + $0x28] sm:$0xff] }
  0x2c   :  { %111 = vmatpush1.msra.mxu0 %v71_v4  ;;  %v66_v10 = vld [vmem:[#allocation2 + $0x38] sm:$0xff]  ;;  %316 = vmatprep.subr.mxu1 %v226_v9  ;;  %v65_v12 = vld [vmem:[#allocation2 + $0x30] sm:$0xff]  ;;  %v63_v17 = vld [vmem:[#allocation2 + $0x20] sm:$0xff] }
  0x2d   :  { %112 = vmatprep.subr.mxu0 %v70_v5  ;;  %317 = vmatpush1.msra.mxu1 %v225_v11  ;;  %v222_v13 = vld [vmem:[#allocation4 + $0x1c8] sm:$0xff]  ;;  %v221_v14 = vld [vmem:[#allocation4 + $0x1c0] sm:$0xff]  ;;  %v60_v24 = vld [vmem:[#allocation2 + $0x8] sm:$0xff] }
  0x2e   :  { %113 = vmatpush1.msra.mxu0 %v69_v6  ;;  %318 = vmatprep.subr.mxu1 %v222_v13  ;;  %v218_v16 = vld [vmem:[#allocation4 + $0x1a8] sm:$0xff]  ;;  %v217_v18 = vld [vmem:[#allocation4 + $0x1a0] sm:$0xff]  ;;  %v59_v26 = vld [vmem:[#allocation2] sm:$0xff] }
  0x2f   :  { %114 = vmatprep.subr.mxu0 %v68_v7  ;;  %319 = vmatpush1.msra.mxu1 %v221_v14  ;;  %v214_v19 = vld [vmem:[#allocation4 + $0x188] sm:$0xff]  ;;  %v213_v21 = vld [vmem:[#allocation4 + $0x180] sm:$0xff]  ;;  %v58_v28 = vld [vmem:[%s889_s0] sm:$0xff] }
  0x30   :  { %115 = vmatpush1.msra.mxu0 %v67_v8  ;;  %v62_v20 = vld [vmem:[#allocation2 + $0x18] sm:$0xff]  ;;  %320 = vmatprep.subr.mxu1 %v218_v16  ;;  %v61_v22 = vld [vmem:[#allocation2 + $0x10] sm:$0xff]  ;;  %v228_v29 = vld [vmem:[#allocation4 + $0x1f8] sm:$0xff] }
  0x31   :  { %116 = vmatprep.subr.mxu0 %v66_v10  ;;  %321 = vmatpush1.msra.mxu1 %v217_v18  ;;  %v210_v23 = vld [vmem:[#allocation4 + $0x168] sm:$0xff]  ;;  %v209_v25 = vld [vmem:[#allocation4 + $0x160] sm:$0xff]  ;;  %v227_v30 = vld [vmem:[#allocation4 + $0x1f0] sm:$0xff] }
  0x32   :  { %117 = vmatpush1.msra.mxu0 %v65_v12  ;;  %322 = vmatprep.subr.mxu1 %v214_v19  ;;  %v206_v27 = vld [vmem:[#allocation4 + $0x148] sm:$0xff]  ;;  %v205_v31 = vld [vmem:[#allocation4 + $0x140] sm:$0xff]  ;;  %v224_v32 = vld [vmem:[#allocation4 + $0x1d8] sm:$0xff] }
  0x33   :  { %118 = vmatprep.subr.mxu0 %v64_v15  ;;  %323 = vmatpush1.msra.mxu1 %v213_v21  ;;  %v202_v33 = vld [vmem:[#allocation4 + $0x128] sm:$0xff]  ;;  %v223_v34 = vld [vmem:[#allocation4 + $0x1d0] sm:$0xff]  ;;  %v201_v35 = vld [vmem:[#allocation4 + $0x120] sm:$0xff] }
  0x34   :  { %119 = vmatpush1.msra.mxu0 %v63_v17  ;;  %324 = vmatprep.subr.mxu1 %v210_v23  ;;  %v220_v36 = vld [vmem:[#allocation4 + $0x1b8] sm:$0xff]  ;;  %v198_v37 = vld [vmem:[#allocation4 + $0x108] sm:$0xff]  ;;  %v219_v38 = vld [vmem:[#allocation4 + $0x1b0] sm:$0xff] }
  0x35   :  { %120 = vmatprep.subr.mxu0 %v62_v20  ;;  %325 = vmatpush1.msra.mxu1 %v209_v25  ;;  %v197_v39 = vld [vmem:[#allocation4 + $0x100] sm:$0xff]  ;;  %v216_v40 = vld [vmem:[#allocation4 + $0x198] sm:$0xff]  ;;  %v194_v41 = vld [vmem:[#allocation4 + $0xe8] sm:$0xff] }
  0x36   :  { %121 = vmatpush1.msra.mxu0 %v61_v22  ;;  %326 = vmatprep.subr.mxu1 %v206_v27  ;;  %v215_v42 = vld [vmem:[#allocation4 + $0x190] sm:$0xff]  ;;  %v193_v43 = vld [vmem:[#allocation4 + $0xe0] sm:$0xff]  ;;  %v212_v44 = vld [vmem:[#allocation4 + $0x178] sm:$0xff] }
  0x37   :  { %122 = vmatprep.subr.mxu0 %v60_v24  ;;  %327 = vmatpush1.msra.mxu1 %v205_v31  ;;  %v190_v45 = vld [vmem:[#allocation4 + $0xc8] sm:$0xff]  ;;  %v211_v46 = vld [vmem:[#allocation4 + $0x170] sm:$0xff]  ;;  %v189_v47 = vld [vmem:[#allocation4 + $0xc0] sm:$0xff] }
  0x38   :  { %123 = vmatpush1.msra.mxu0 %v59_v26  ;;  %328 = vmatprep.subr.mxu1 %v202_v33  ;;  %v208_v48 = vld [vmem:[#allocation4 + $0x158] sm:$0xff]  ;;  %v186_v49 = vld [vmem:[#allocation4 + $0xa8] sm:$0xff]  ;;  %v207_v50 = vld [vmem:[#allocation4 + $0x150] sm:$0xff] }
  0x39   :  { %679 = vmatmul.mubr.msk.f32.vlgmr.msra.gmra.mxu0 %vm88_vm0, %v58_v28  ;;  %387 = vmatprep.subr.mxu0 %v228_v29  ;;  %v185_v51 = vld [vmem:[#allocation4 + $0xa0] sm:$0xff]  ;;  %v204_v52 = vld [vmem:[#allocation4 + $0x138] sm:$0xff]  ;;  %v182_v53 = vld [vmem:[#allocation4 + $0x88] sm:$0xff] }
  0x3a   :  { %388 = vmatpush1.msra.mxu0 %v227_v30  ;;  %329 = vmatpush1.msra.mxu1 %v201_v35  ;;  %v203_v54 = vld [vmem:[#allocation4 + $0x130] sm:$0xff]  ;;  %v181_v55 = vld [vmem:[#allocation4 + $0x80] sm:$0xff]  ;;  %v200_v56 = vld [vmem:[#allocation4 + $0x118] sm:$0xff] }
  0x3b   :  { %389 = vmatprep.subr.mxu0 %v224_v32  ;;  %330 = vmatprep.subr.mxu1 %v198_v37  ;;  %v178_v57 = vld [vmem:[#allocation4 + $0x68] sm:$0xff]  ;;  %v199_v58 = vld [vmem:[#allocation4 + $0x110] sm:$0xff]  ;;  %v177_v59 = vld [vmem:[#allocation4 + $0x60] sm:$0xff] }
  0x3c   :  { %390 = vmatpush1.msra.mxu0 %v223_v34  ;;  %331 = vmatpush1.msra.mxu1 %v197_v39  ;;  %v196_v60 = vld [vmem:[#allocation4 + $0xf8] sm:$0xff]  ;;  %v174_v61 = vld [vmem:[#allocation4 + $0x48] sm:$0xff]  ;;  %v195_v62 = vld [vmem:[#allocation4 + $0xf0] sm:$0xff] }
  0x3d   :  { %391 = vmatprep.subr.mxu0 %v220_v36  ;;  %332 = vmatprep.subr.mxu1 %v194_v41  ;;  %v173_v63 = vld [vmem:[#allocation4 + $0x40] sm:$0xff]  ;;  %v192_v0 = vld [vmem:[#allocation4 + $0xd8] sm:$0xff]  ;;  %v170_v1 = vld [vmem:[#allocation4 + $0x28] sm:$0xff] }
  0x3e   :  { %392 = vmatpush1.msra.mxu0 %v219_v38  ;;  %333 = vmatpush1.msra.mxu1 %v193_v43  ;;  %v191_v2 = vld [vmem:[#allocation4 + $0xd0] sm:$0xff]  ;;  %v169_v3 = vld [vmem:[#allocation4 + $0x20] sm:$0xff]  ;;  %v188_v4 = vld [vmem:[#allocation4 + $0xb8] sm:$0xff] }
  0x3f   :  { %393 = vmatprep.subr.mxu0 %v216_v40  ;;  %334 = vmatprep.subr.mxu1 %v190_v45  ;;  %v166_v5 = vld [vmem:[#allocation4 + $0x8] sm:$0xff]  ;;  %v187_v6 = vld [vmem:[#allocation4 + $0xb0] sm:$0xff]  ;;  %v165_v7 = vld [vmem:[#allocation4] sm:$0xff] }
  0x40   :  { %394 = vmatpush1.msra.mxu0 %v215_v42  ;;  %335 = vmatpush1.msra.mxu1 %v189_v47  ;;  %v184_v8 = vld [vmem:[#allocation4 + $0x98] sm:$0xff]  ;;  %v290_v9 = vld [vmem:[#allocation4 + $0x3e8] sm:$0xff]  ;;  %v183_v10 = vld [vmem:[#allocation4 + $0x90] sm:$0xff] }
  0x41   :  { %395 = vmatprep.subr.mxu0 %v212_v44  ;;  %336 = vmatprep.subr.mxu1 %v186_v49  ;;  %v289_v11 = vld [vmem:[#allocation4 + $0x3e0] sm:$0xff]  ;;  %v180_v12 = vld [vmem:[#allocation4 + $0x78] sm:$0xff]  ;;  %v286_v13 = vld [vmem:[#allocation4 + $0x3c8] sm:$0xff] }
  0x42   :  { %396 = vmatpush1.msra.mxu0 %v211_v46  ;;  %337 = vmatpush1.msra.mxu1 %v185_v51  ;;  %v179_v14 = vld [vmem:[#allocation4 + $0x70] sm:$0xff]  ;;  %v285_v15 = vld [vmem:[#allocation4 + $0x3c0] sm:$0xff]  ;;  %v176_v16 = vld [vmem:[#allocation4 + $0x58] sm:$0xff] }
  0x43   :  { %397 = vmatprep.subr.mxu0 %v208_v48  ;;  %338 = vmatprep.subr.mxu1 %v182_v53  ;;  %v282_v17 = vld [vmem:[#allocation4 + $0x3a8] sm:$0xff]  ;;  %v175_v18 = vld [vmem:[#allocation4 + $0x50] sm:$0xff]  ;;  %v281_v19 = vld [vmem:[#allocation4 + $0x3a0] sm:$0xff] }
  0x44   :  { %398 = vmatpush1.msra.mxu0 %v207_v50  ;;  %339 = vmatpush1.msra.mxu1 %v181_v55  ;;  %v172_v20 = vld [vmem:[#allocation4 + $0x38] sm:$0xff]  ;;  %v278_v21 = vld [vmem:[#allocation4 + $0x388] sm:$0xff]  ;;  %v171_v22 = vld [vmem:[#allocation4 + $0x30] sm:$0xff] }
  0x45   :  { %399 = vmatprep.subr.mxu0 %v204_v52  ;;  %340 = vmatprep.subr.mxu1 %v178_v57  ;;  %v277_v23 = vld [vmem:[#allocation4 + $0x380] sm:$0xff]  ;;  %v168_v24 = vld [vmem:[#allocation4 + $0x18] sm:$0xff]  ;;  %v274_v25 = vld [vmem:[#allocation4 + $0x368] sm:$0xff] }
  0x46   :  { %400 = vmatpush1.msra.mxu0 %v203_v54  ;;  %341 = vmatpush1.msra.mxu1 %v177_v59  ;;  %v167_v26 = vld [vmem:[#allocation4 + $0x10] sm:$0xff]  ;;  %v273_v27 = vld [vmem:[#allocation4 + $0x360] sm:$0xff]  ;;  %v292_v28 = vld [vmem:[#allocation4 + $0x3f8] sm:$0xff] }
  0x47   :  { %401 = vmatprep.subr.mxu0 %v200_v56  ;;  %342 = vmatprep.subr.mxu1 %v174_v61  ;;  %v270_v29 = vld [vmem:[#allocation4 + $0x348] sm:$0xff]  ;;  %v291_v30 = vld [vmem:[#allocation4 + $0x3f0] sm:$0xff]  ;;  %v269_v31 = vld [vmem:[#allocation4 + $0x340] sm:$0xff] }
  0x48   :  { %402 = vmatpush1.msra.mxu0 %v199_v58  ;;  %343 = vmatpush1.msra.mxu1 %v173_v63  ;;  %v288_v32 = vld [vmem:[#allocation4 + $0x3d8] sm:$0xff]  ;;  %v266_v33 = vld [vmem:[#allocation4 + $0x328] sm:$0xff]  ;;  %v287_v34 = vld [vmem:[#allocation4 + $0x3d0] sm:$0xff] }
  0x49   :  { %403 = vmatprep.subr.mxu0 %v196_v60  ;;  %344 = vmatprep.subr.mxu1 %v170_v1  ;;  %v265_v35 = vld [vmem:[#allocation4 + $0x320] sm:$0xff]  ;;  %v284_v36 = vld [vmem:[#allocation4 + $0x3b8] sm:$0xff]  ;;  %v262_v37 = vld [vmem:[#allocation4 + $0x308] sm:$0xff] }
  0x4a   :  { %404 = vmatpush1.msra.mxu0 %v195_v62  ;;  %345 = vmatpush1.msra.mxu1 %v169_v3  ;;  %v283_v38 = vld [vmem:[#allocation4 + $0x3b0] sm:$0xff]  ;;  %v261_v39 = vld [vmem:[#allocation4 + $0x300] sm:$0xff]  ;;  %v280_v40 = vld [vmem:[#allocation4 + $0x398] sm:$0xff] }
  0x4b   :  { %405 = vmatprep.subr.mxu0 %v192_v0  ;;  %346 = vmatprep.subr.mxu1 %v166_v5  ;;  %v258_v41 = vld [vmem:[#allocation4 + $0x2e8] sm:$0xff]  ;;  %v279_v42 = vld [vmem:[#allocation4 + $0x390] sm:$0xff]  ;;  %v257_v43 = vld [vmem:[#allocation4 + $0x2e0] sm:$0xff] }
  0x4c   :  { %406 = vmatpush1.msra.mxu0 %v191_v2  ;;  %347 = vmatpush1.msra.mxu1 %v165_v7  ;;  %v276_v44 = vld [vmem:[#allocation4 + $0x378] sm:$0xff]  ;;  %v254_v45 = vld [vmem:[#allocation4 + $0x2c8] sm:$0xff]  ;;  %v275_v46 = vld [vmem:[#allocation4 + $0x370] sm:$0xff] }
  0x4d   :  { %407 = vmatprep.subr.mxu0 %v188_v4  ;;  %348 = vmatprep.subr.mxu1 %v290_v9  ;;  %v253_v47 = vld [vmem:[#allocation4 + $0x2c0] sm:$0xff]  ;;  %v272_v48 = vld [vmem:[#allocation4 + $0x358] sm:$0xff]  ;;  %v250_v49 = vld [vmem:[#allocation4 + $0x2a8] sm:$0xff] }
  0x4e   :  { %408 = vmatpush1.msra.mxu0 %v187_v6  ;;  %349 = vmatpush2.msra.mxu1 %v289_v11  ;;  %v271_v50 = vld [vmem:[#allocation4 + $0x350] sm:$0xff]  ;;  %v249_v51 = vld [vmem:[#allocation4 + $0x2a0] sm:$0xff]  ;;  %v268_v52 = vld [vmem:[#allocation4 + $0x338] sm:$0xff] }
  0x4f   :  { %409 = vmatprep.subr.mxu0 %v184_v8  ;;  %350 = vmatprep.subr.mxu1 %v286_v13  ;;  %v246_v53 = vld [vmem:[#allocation4 + $0x288] sm:$0xff]  ;;  %v267_v54 = vld [vmem:[#allocation4 + $0x330] sm:$0xff]  ;;  %v245_v55 = vld [vmem:[#allocation4 + $0x280] sm:$0xff] }
  0x50   :  { %410 = vmatpush1.msra.mxu0 %v183_v10  ;;  %351 = vmatpush2.msra.mxu1 %v285_v15  ;;  %v264_v56 = vld [vmem:[#allocation4 + $0x318] sm:$0xff]  ;;  %v263_v57 = vld [vmem:[#allocation4 + $0x310] sm:$0xff]  ;;  %v242_v2 = vld [vmem:[#allocation4 + $0x268] sm:$0xff] }
  0x51   :  { %411 = vmatprep.subr.mxu0 %v180_v12  ;;  %352 = vmatprep.subr.mxu1 %v282_v17  ;;  %v260_v58 = vld [vmem:[#allocation4 + $0x2f8] sm:$0xff]  ;;  %v259_v59 = vld [vmem:[#allocation4 + $0x2f0] sm:$0xff]  ;;  %v241_v4 = vld [vmem:[#allocation4 + $0x260] sm:$0xff] }
  0x52   :  { %412 = vmatpush1.msra.mxu0 %v179_v14  ;;  %353 = vmatpush2.msra.mxu1 %v281_v19  ;;  %v256_v60 = vld [vmem:[#allocation4 + $0x2d8] sm:$0xff]  ;;  %v255_v61 = vld [vmem:[#allocation4 + $0x2d0] sm:$0xff]  ;;  %v238_v6 = vld [vmem:[#allocation4 + $0x248] sm:$0xff] }
  0x53   :  { %413 = vmatprep.subr.mxu0 %v176_v16  ;;  %354 = vmatprep.subr.mxu1 %v278_v21  ;;  %v252_v62 = vld [vmem:[#allocation4 + $0x2b8] sm:$0xff]  ;;  %v251_v63 = vld [vmem:[#allocation4 + $0x2b0] sm:$0xff]  ;;  %v237_v8 = vld [vmem:[#allocation4 + $0x240] sm:$0xff] }
  0x54   :  { %414 = vmatpush1.msra.mxu0 %v175_v18  ;;  %355 = vmatpush2.msra.mxu1 %v277_v23  ;;  %v248_v0 = vld [vmem:[#allocation4 + $0x298] sm:$0xff]  ;;  %v247_v1 = vld [vmem:[#allocation4 + $0x290] sm:$0xff]  ;;  %v234_v10 = vld [vmem:[#allocation4 + $0x228] sm:$0xff] }
  0x55   :  { %415 = vmatprep.subr.mxu0 %v172_v20  ;;  %356 = vmatprep.subr.mxu1 %v274_v25  ;;  %v244_v3 = vld [vmem:[#allocation4 + $0x278] sm:$0xff]  ;;  %v243_v5 = vld [vmem:[#allocation4 + $0x270] sm:$0xff]  ;;  %v233_v12 = vld [vmem:[#allocation4 + $0x220] sm:$0xff]  ;;  %v78_v20 = vlaneseq }
  0x56   :  { %416 = vmatpush1.msra.mxu0 %v171_v22  ;;  %357 = vmatpush2.msra.mxu1 %v273_v27  ;;  %v240_v7 = vld [vmem:[#allocation4 + $0x258] sm:$0xff]  ;;  %v239_v9 = vld [vmem:[#allocation4 + $0x250] sm:$0xff]  ;;  %v230_v14 = vld [vmem:[#allocation4 + $0x208] sm:$0xff] }
  0x57   :  { %417 = vmatprep.subr.mxu0 %v168_v24  ;;  %358 = vmatprep.subr.mxu1 %v270_v29  ;;  %v236_v11 = vld [vmem:[#allocation4 + $0x238] sm:$0xff]  ;;  %v235_v13 = vld [vmem:[#allocation4 + $0x230] sm:$0xff]  ;;  %v229_v16 = vld [vmem:[#allocation4 + $0x200] sm:$0xff]  ;;  %v872_v21 = vshrl.u32 %v78_v20, 7 }
  0x58   :  { %418 = vmatpush1.msra.mxu0 %v167_v26  ;;  %359 = vmatpush2.msra.mxu1 %v269_v31  ;;  %v232_v15 = vld [vmem:[#allocation4 + $0x218] sm:$0xff]  ;;  %v231_v17 = vld [vmem:[#allocation4 + $0x210] sm:$0xff] }
  0x59   :  { %419 = vmatprep.subr.mxu0 %v292_v28  ;;  %360 = vmatprep.subr.mxu1 %v266_v33  ;;  %v493_v18 = vld [vmem:[#allocation6 + $0xf8] sm:$0xff]  ;;  %v80_v22 = vsub.s32 0, %v872_v21  ;;  %v84_v24 = vsub.s32 1, %v872_v21  ;;  %v512_v20 = vld [vmem:[#allocation6 + $0x190] sm:$0xff] }
  0x5a   :  { %420 = vmatpush2.msra.mxu0 %v291_v30  ;;  %361 = vmatpush2.msra.mxu1 %v265_v35  ;;  %v525_v19 = vld [vmem:[#allocation6 + $0x1f8] sm:$0xff]  ;;  %v492_v35 = vld [vmem:[#allocation6 + $0xf0] sm:$0xff] }
  0x5b   :  { %421 = vmatprep.subr.mxu0 %v288_v32  ;;  %362 = vmatprep.subr.mxu1 %v262_v37  ;;  %v76_v23 = vld [vmem:[#allocation2 + $0x80] ss:$8 sm:$0x3] }
  0x5c   :  { %422 = vmatpush2.msra.mxu0 %v287_v34  ;;  %363 = vmatpush2.msra.mxu1 %v261_v39  ;;  %v81_v25 = vrot.slane %v76_v23, %v80_v22  ;;  %v85_v26 = vrot.slane %v76_v23, %v84_v24  ;;  %v477_v33 = vld [vmem:[#allocation6 + $0x78] sm:$0xff]  ;;  %v476_v37 = vld [vmem:[#allocation6 + $0x70] sm:$0xff]  ;;  %v491_v39 = vld [vmem:[#allocation6 + $0xe8] sm:$0xff] }
  0x5d   :  { %423 = vmatprep.subr.mxu0 %v284_v36  ;;  %364 = vmatprep.subr.mxu1 %v258_v41  ;;  %v509_v34 = vld [vmem:[#allocation6 + $0x178] sm:$0xff]  ;;  %v524_v36 = vld [vmem:[#allocation6 + $0x1f0] sm:$0xff]  ;;  %v475_v41 = vld [vmem:[#allocation6 + $0x68] sm:$0xff] }
  0x5e   :  { %424 = vmatpush2.msra.mxu0 %v283_v38  ;;  %365 = vmatpush2.msra.mxu1 %v257_v43  ;;  %v508_v38 = vld [vmem:[#allocation6 + $0x170] sm:$0xff]  ;;  %v490_v43 = vld [vmem:[#allocation6 + $0xe0] sm:$0xff] }
  0x5f   :  { %425 = vmatprep.subr.mxu0 %v280_v40  ;;  %366 = vmatprep.subr.mxu1 %v254_v45  ;;  %v523_v40 = vld [vmem:[#allocation6 + $0x1e8] sm:$0xff]  ;;  %v474_v45 = vld [vmem:[#allocation6 + $0x60] sm:$0xff]  ;;  %v464_v23 = vld [vmem:[#allocation6 + $0x10] sm:$0xff] }
  0x60   :  { %426 = vmatpush2.msra.mxu0 %v279_v42  ;;  %367 = vmatpush2.msra.mxu1 %v253_v47  ;;  %v507_v42 = vld [vmem:[#allocation6 + $0x168] sm:$0xff]  ;;  %v489_v47 = vld [vmem:[#allocation6 + $0xd8] sm:$0xff] }
  0x61   :  { %427 = vmatprep.subr.mxu0 %v276_v44  ;;  %368 = vmatprep.subr.mxu1 %v250_v49  ;;  %v522_v44 = vld [vmem:[#allocation6 + $0x1e0] sm:$0xff]  ;;  %v473_v49 = vld [vmem:[#allocation6 + $0x58] sm:$0xff] }
  0x62   :  { %428 = vmatpush2.msra.mxu0 %v275_v46  ;;  %369 = vmatpush2.msra.mxu1 %v249_v51  ;;  %v506_v46 = vld [vmem:[#allocation6 + $0x160] sm:$0xff]  ;;  %v488_v51 = vld [vmem:[#allocation6 + $0xd0] sm:$0xff] }
  0x63   :  { %429 = vmatprep.subr.mxu0 %v272_v48  ;;  %370 = vmatprep.subr.mxu1 %v246_v53  ;;  %v521_v48 = vld [vmem:[#allocation6 + $0x1d8] sm:$0xff]  ;;  %v472_v53 = vld [vmem:[#allocation6 + $0x50] sm:$0xff] }
  0x64   :  { %430 = vmatpush2.msra.mxu0 %v271_v50  ;;  %371 = vmatpush2.msra.mxu1 %v245_v55  ;;  %v505_v50 = vld [vmem:[#allocation6 + $0x158] sm:$0xff]  ;;  %v487_v55 = vld [vmem:[#allocation6 + $0xc8] sm:$0xff] }
  0x65   :  { %431 = vmatprep.subr.mxu0 %v268_v52  ;;  %372 = vmatprep.subr.mxu1 %v242_v2  ;;  %v520_v52 = vld [vmem:[#allocation6 + $0x1d0] sm:$0xff]  ;;  %v501_v2 = vld [vmem:[#allocation6 + $0x138] sm:$0xff] }
  0x66   :  { %432 = vmatpush2.msra.mxu0 %v267_v54  ;;  %373 = vmatpush2.msra.mxu1 %v241_v4  ;;  %v504_v54 = vld [vmem:[#allocation6 + $0x150] sm:$0xff] }
  0x67   :  { %433 = vmatprep.subr.mxu0 %v264_v56  ;;  %374 = vmatprep.subr.mxu1 %v238_v6  ;;  %v519_v56 = vld [vmem:[#allocation6 + $0x1c8] sm:$0xff]  ;;  %v516_v4 = vld [vmem:[#allocation6 + $0x1b0] sm:$0xff] }
  0x68   :  { %434 = vmatpush2.msra.mxu0 %v263_v57  ;;  %375 = vmatpush2.msra.mxu1 %v237_v8  ;;  %v471_v57 = vld [vmem:[#allocation6 + $0x48] sm:$0xff]  ;;  %v500_v6 = vld [vmem:[#allocation6 + $0x130] sm:$0xff] }
  0x69   :  { %435 = vmatprep.subr.mxu0 %v260_v58  ;;  %376 = vmatprep.subr.mxu1 %v234_v10  ;;  %v503_v58 = vld [vmem:[#allocation6 + $0x148] sm:$0xff] }
  0x6a   :  { %436 = vmatpush2.msra.mxu0 %v259_v59  ;;  %377 = vmatpush2.msra.mxu1 %v233_v12  ;;  %v486_v59 = vld [vmem:[#allocation6 + $0xc0] sm:$0xff]  ;;  %v515_v8 = vld [vmem:[#allocation6 + $0x1a8] sm:$0xff] }
  0x6b   :  { %437 = vmatprep.subr.mxu0 %v256_v60  ;;  %378 = vmatprep.subr.mxu1 %v230_v14  ;;  %v518_v60 = vld [vmem:[#allocation6 + $0x1c0] sm:$0xff]  ;;  %v499_v10 = vld [vmem:[#allocation6 + $0x128] sm:$0xff] }
  0x6c   :  { %438 = vmatpush2.msra.mxu0 %v255_v61  ;;  %379 = vmatpush2.msra.mxu1 %v229_v16  ;;  %v470_v61 = vld [vmem:[#allocation6 + $0x40] sm:$0xff]  ;;  %v513_v16 = vld [vmem:[#allocation6 + $0x198] sm:$0xff] }
  0x6d   :  { %439 = vmatprep.subr.mxu0 %v252_v62  ;;  %681 = vmatprep.subr.mxu1 %v493_v18  ;;  %v502_v62 = vld [vmem:[#allocation6 + $0x140] sm:$0xff]  ;;  %v497_v18 = vld [vmem:[#allocation6 + $0x118] sm:$0xff] }
  0x6e   :  { %440 = vmatpush2.msra.mxu0 %v251_v63  ;;  %v485_v63 = vld [vmem:[#allocation6 + $0xb8] sm:$0xff]  ;;  %v514_v12 = vld [vmem:[#allocation6 + $0x1a0] sm:$0xff] }
  0x6f   :  { %441 = vmatprep.subr.mxu0 %v248_v0  ;;  %v517_v0 = vld [vmem:[#allocation6 + $0x1b8] sm:$0xff]  ;;  %v498_v14 = vld [vmem:[#allocation6 + $0x120] sm:$0xff] }
  0x70   :  { %442 = vmatpush2.msra.mxu0 %v247_v1  ;;  %v469_v1 = vld [vmem:[#allocation6 + $0x38] sm:$0xff] }
  0x71   :  { %443 = vmatprep.subr.mxu0 %v244_v3  ;;  %v484_v3 = vld [vmem:[#allocation6 + $0xb0] sm:$0xff] }
  0x72   :  { %444 = vmatpush2.msra.mxu0 %v243_v5  ;;  %v468_v5 = vld [vmem:[#allocation6 + $0x30] sm:$0xff] }
  0x73   :  { %445 = vmatprep.subr.mxu0 %v240_v7  ;;  %v483_v7 = vld [vmem:[#allocation6 + $0xa8] sm:$0xff] }
  0x74   :  { %446 = vmatpush2.msra.mxu0 %v239_v9  ;;  %v467_v9 = vld [vmem:[#allocation6 + $0x28] sm:$0xff] }
  0x75   :  { %447 = vmatprep.subr.mxu0 %v236_v11  ;;  %v482_v11 = vld [vmem:[#allocation6 + $0xa0] sm:$0xff] }
  0x76   :  { %448 = vmatpush2.msra.mxu0 %v235_v13  ;;  %v466_v13 = vld [vmem:[#allocation6 + $0x20] sm:$0xff] }
  0x77   :  { %449 = vmatprep.subr.mxu0 %v232_v15  ;;  %v481_v15 = vld [vmem:[#allocation6 + $0x98] sm:$0xff] }
  0x78   :  { %450 = vmatpush2.msra.mxu0 %v231_v17  ;;  %v465_v17 = vld [vmem:[#allocation6 + $0x18] sm:$0xff] }
  0x79   :  { %716 = vmatprep.subr.mxu0 %v525_v19  ;;  %v480_v19 = vld [vmem:[#allocation6 + $0x90] sm:$0xff] }
  0xf9   :  { %v158_v27 = vpop.f32.mrf.mxu0 }
  0xfa   :  { %v159_v28 = vadd.f32 %v158_v27, %v81_v25  ;;  %v496_v25 = vld [vmem:[#allocation6 + $0x110] sm:$0xff]  ;;  %v511_v27 = vld [vmem:[#allocation6 + $0x188] sm:$0xff] }
  0xfb   :  { %v160_v29 = vpop.f32.mrf.mxu0 }
  0xfc   :  { %v161_v30 = vadd.f32 %v160_v29, %v85_v26  ;;  %v163_v32 = vmax.f32 %v159_v28, 0.0  ;;  %v479_v26 = vld [vmem:[#allocation6 + $0x88] sm:$0xff] }
  0xfd   :  { %v463_v28 = vld [vmem:[#allocation6 + $0x8] sm:$0xff] }
  0xfe   :  { %v164_v31 = vmax.f32 %v161_v30, 0.0  ;;  %v495_v29 = vld [vmem:[#allocation6 + $0x108] sm:$0xff]  ;;  %v478_v30 = vld [vmem:[#allocation6 + $0x80] sm:$0xff] }
 0x100   :  { %380 = vmatprep.mubr.f32.mxu1 %v164_v31  ;;  %451 = vmatprep.mubr.f32.mxu0 %v164_v31  ;;  %v510_v31 = vld [vmem:[#allocation6 + $0x180] sm:$0xff] }
 0x101   :  { %381 = vmatmul.mubr.f32.vlgmr.msra.gmra.mxu1 %v163_v32  ;;  %452 = vmatmul.mubr.f32.vlgmr.msra.gmra.mxu0 %v163_v32  ;;  %v462_v32 = vld [vmem:[#allocation6] sm:$0xff] }
 0x102   :  { %682 = vmatpush3.msra.mxu1 %v477_v33  ;;  %717 = vmatpush3.msra.mxu0 %v509_v34  ;;  %v494_v33 = vld [vmem:[#allocation6 + $0x100] sm:$0xff]  ;;  %v306_v34 = vsub.s32 2, %v872_v21 }
 0x103   :  { %683 = vmatprep.subr.mxu1 %v492_v35  ;;  %718 = vmatprep.subr.mxu0 %v524_v36  ;;  %v294_v35 = vld [vmem:[#allocation4 + $0x400] ss:$8 sm:$0xf]  ;;  %v310_v36 = vsub.s32 3, %v872_v21 }
 0x104   :  { %684 = vmatpush3.msra.mxu1 %v476_v37  ;;  %719 = vmatpush3.msra.mxu0 %v508_v38  ;;  %v299_v37 = vrot.slane %v294_v35, %v80_v22  ;;  %v307_v38 = vrot.slane %v294_v35, %v306_v34 }
 0x105   :  { %685 = vmatprep.subr.mxu1 %v491_v39  ;;  %720 = vmatprep.subr.mxu0 %v523_v40  ;;  %v303_v39 = vrot.slane %v294_v35, %v84_v24  ;;  %v311_v40 = vrot.slane %v294_v35, %v310_v36  ;;  %v680_v24 = vld [vmem:[#allocation6 + $0x200] ss:$0 sm:$0xff] }
 0x106   :  { %686 = vmatpush3.msra.mxu1 %v475_v41  ;;  %721 = vmatpush3.msra.mxu0 %v507_v42 }
 0x107   :  { %687 = vmatprep.subr.mxu1 %v490_v43  ;;  %722 = vmatprep.subr.mxu0 %v522_v44 }
 0x108   :  { %688 = vmatpush3.msra.mxu1 %v474_v45  ;;  %723 = vmatpush3.msra.mxu0 %v506_v46 }
 0x109   :  { %689 = vmatprep.subr.mxu1 %v489_v47  ;;  %724 = vmatprep.subr.mxu0 %v521_v48 }
 0x10a   :  { %690 = vmatpush3.msra.mxu1 %v473_v49  ;;  %725 = vmatpush3.msra.mxu0 %v505_v50 }
 0x10b   :  { %691 = vmatprep.subr.mxu1 %v488_v51  ;;  %726 = vmatprep.subr.mxu0 %v520_v52 }
 0x10c   :  { %692 = vmatpush3.msra.mxu1 %v472_v53  ;;  %727 = vmatpush3.msra.mxu0 %v504_v54 }
 0x10d   :  { %693 = vmatprep.subr.mxu1 %v487_v55  ;;  %728 = vmatprep.subr.mxu0 %v519_v56 }
 0x10e   :  { %694 = vmatpush3.msra.mxu1 %v471_v57  ;;  %729 = vmatpush3.msra.mxu0 %v503_v58 }
 0x10f   :  { %695 = vmatprep.subr.mxu1 %v486_v59  ;;  %730 = vmatprep.subr.mxu0 %v518_v60 }
 0x110   :  { %696 = vmatpush3.msra.mxu1 %v470_v61  ;;  %731 = vmatpush3.msra.mxu0 %v502_v62 }
 0x111   :  { %697 = vmatprep.subr.mxu1 %v485_v63  ;;  %732 = vmatprep.subr.mxu0 %v517_v0 }
 0x112   :  { %698 = vmatpush3.msra.mxu1 %v469_v1  ;;  %733 = vmatpush3.msra.mxu0 %v501_v2 }
 0x113   :  { %699 = vmatprep.subr.mxu1 %v484_v3  ;;  %734 = vmatprep.subr.mxu0 %v516_v4 }
 0x114   :  { %700 = vmatpush3.msra.mxu1 %v468_v5  ;;  %735 = vmatpush3.msra.mxu0 %v500_v6 }
 0x115   :  { %701 = vmatprep.subr.mxu1 %v483_v7  ;;  %736 = vmatprep.subr.mxu0 %v515_v8 }
 0x116   :  { %702 = vmatpush3.msra.mxu1 %v467_v9  ;;  %737 = vmatpush3.msra.mxu0 %v499_v10 }
 0x117   :  { %703 = vmatprep.subr.mxu1 %v482_v11  ;;  %738 = vmatprep.subr.mxu0 %v514_v12 }
 0x118   :  { %704 = vmatpush3.msra.mxu1 %v466_v13  ;;  %739 = vmatpush3.msra.mxu0 %v498_v14 }
 0x119   :  { %705 = vmatprep.subr.mxu1 %v481_v15  ;;  %740 = vmatprep.subr.mxu0 %v513_v16 }
 0x11a   :  { %706 = vmatpush3.msra.mxu1 %v465_v17  ;;  %741 = vmatpush3.msra.mxu0 %v497_v18 }
 0x11b   :  { %707 = vmatprep.subr.mxu1 %v480_v19  ;;  %742 = vmatprep.subr.mxu0 %v512_v20 }
 0x11c   :  { %708 = vmatpush3.msra.mxu1 %v464_v23  ;;  %743 = vmatpush3.msra.mxu0 %v496_v25 }
 0x11d   :  { %709 = vmatprep.subr.mxu1 %v479_v26  ;;  %744 = vmatprep.subr.mxu0 %v511_v27 }
 0x11e   :  { %710 = vmatpush3.msra.mxu1 %v463_v28  ;;  %745 = vmatpush3.msra.mxu0 %v495_v29 }
 0x11f   :  { %711 = vmatprep.subr.mxu1 %v478_v30  ;;  %746 = vmatprep.subr.mxu0 %v510_v31 }
 0x120   :  { %712 = vmatpush3.msra.mxu1 %v462_v32  ;;  %747 = vmatpush3.msra.mxu0 %v494_v33 }
 0x1c1   :  { %v382_v41 = vpop.f32.mrf.mxu1  ;;  %v453_v42 = vpop.f32.mrf.mxu0 }
 0x1c2   :  { %v383_v43 = vadd.f32 %v382_v41, %v299_v37  ;;  %v454_v44 = vadd.f32 %v453_v42, %v307_v38 }
 0x1c3   :  { %v384_v45 = vpop.f32.mrf.mxu1  ;;  %v455_v46 = vpop.f32.mrf.mxu0 }
 0x1c4   :  { %v385_v47 = vadd.f32 %v384_v45, %v303_v39  ;;  %v456_v48 = vadd.f32 %v455_v46, %v311_v40  ;;  %v458_v51 = vmax.f32 %v383_v43, 0.0  ;;  %v460_v52 = vmax.f32 %v454_v44, 0.0 }
 0x1c6   :  { %v459_v49 = vmax.f32 %v385_v47, 0.0  ;;  %v461_v50 = vmax.f32 %v456_v48, 0.0 }
 0x1c8   :  { %595 = vmatprep.mubr.f32.mxu1 %v459_v49  ;;  %665 = vmatprep.mubr.f32.mxu0 %v461_v50 }
 0x1c9   :  { %596 = vmatmul.mubr.f32.vlgmr.msra.gmra.mxu1 %v458_v51  ;;  %666 = vmatmul.mubr.f32.vlgmr.msra.gmra.mxu0 %v460_v52 }
 0x289   :  { %v713_v22 = vpop.f32.mrf.mxu1  ;;  %v748_v21 = vpop.f32.mrf.mxu0 }
 0x28b   :  { %v714_v53 = vpop.f32.mrf.mxu1  ;;  %v749_v54 = vpop.f32.mrf.mxu0 }
 0x28c   :  { %v715_v55 = vadd.f32 %v714_v53, %v713_v22  ;;  %v750_v57 = vadd.f32 %v749_v54, %v748_v21 }
 0x28e   :  { %v598_v56 = vadd.f32 %v715_v55, %v680_v24 }
 0x290   :  { %v668_v58 = vadd.f32 %v750_v57, %v598_v56 }
 0x292   :  { %v671_v59 = vmax.f32 %v668_v58, 0.0 }
 0x294   :  { %672 = vst [vmem:[%s893_s4] sm:$0xff] %v671_v59 }
 0x295   :  { %677 = vsyncpa [#allocation3], 1 }
 0x296   :  { %678 = vsyncpa [#allocation5], 1 }

</bundles_post_ra>
